<compile_context>
chip_gen: v7x
topology: tpu7x:2x2x1
jax: 0.10.0
libtpu: 0.0.40
codegen_flags: <defaults>
</compile_context>

<pallas_src>
import jax
import jax.numpy as jnp
from jax.experimental import pallas as pl
from jax.experimental.pallas import tpu as pltpu


def _round_up(n, m):
    return (n + m - 1) // m * m


def mlp_kernel(x_ref, w1_ref, b1_ref, w2_ref, b2_ref, w3_ref, b3_ref, o_ref):
    w1 = w1_ref[...]
    # Cast x to the weight dtype inside the kernel (no extra XLA pass over x in HBM).
    x = x_ref[...].astype(w1.dtype)
    # Layer 1: [TB, S] @ [S, 128] + [1, 128] -> ReLU   (f32 accumulate)
    h1 = jnp.dot(x, w1, preferred_element_type=jnp.float32)
    h1 = jnp.maximum(h1 + b1_ref[...], 0.0)
    # Layer 2: [TB, 128] @ [128, 32] + [1, 32] -> ReLU
    w2 = w2_ref[...]
    h2 = jnp.dot(h1.astype(w2.dtype), w2, preferred_element_type=jnp.float32)
    h2 = jnp.maximum(h2 + b2_ref[...], 0.0)
    # Layer 3: [TB, 32] @ [32, A] + [1, A] -> ReLU   (A = true action_size, no padding)
    w3 = w3_ref[...]
    q = jnp.dot(h2.astype(w3.dtype), w3, preferred_element_type=jnp.float32)
    q = jnp.maximum(q + b3_ref[...], 0.0)
    o_ref[...] = q.astype(o_ref.dtype)


def mlp_forward(x, w1, b1, w2, b2, w3, b3, *, block_batch=2048):
    """x: [B, state_size] (f32 or bf16); weights pre-transposed to [in, out]; biases [1, out].

    Weights may be float32 or bfloat16; accumulation is always float32.
    The hot path is a single pallas_call: no pads, casts, or slices in the wrapper.
    """
    B, S = x.shape
    H1 = w1.shape[1]
    H2 = w2.shape[1]
    A = w3.shape[1]

    # Batch tile: large tiles amortize per-step overhead (v5e/v6e), but cap at cdiv(B,4)
    # so large batches always give multiple grid steps -> both v7x TCs stay busy and
    # double-buffering has work to overlap. Ragged last block is masked by Pallas.
    TB = _round_up(min(block_batch, max(pl.cdiv(B, 4), 1)), 8)
    grid = (pl.cdiv(B, TB),)

    # Weights/biases: constant block index -> DMA'd once, stay VMEM-resident.
    const = lambda shape: pl.BlockSpec(shape, lambda i: (0, 0))

    out = pl.pallas_call(
        mlp_kernel,
        out_shape=jax.ShapeDtypeStruct((B, A), jnp.float32),
        grid=grid,
        in_specs=[
            pl.BlockSpec((TB, S), lambda i: (i, 0)),   # x: tiled along batch (ragged OK)
            const((S, H1)), const((1, H1)),            # layer 1
            const((H1, H2)), const((1, H2)),           # layer 2
            const((H2, A)), const((1, A)),             # layer 3 (true width)
        ],
        out_specs=pl.BlockSpec((TB, A), lambda i: (i, 0)),
        compiler_params=pltpu.CompilerParams(
            dimension_semantics=("parallel",)),        # shard batch across TCs on v7x
    )(x, w1, b1, w2, b2, w3, b3)

    return out


def init_linear_params(key, in_features, out_features, dtype=jnp.float32):
    # Deterministic init mirroring torch.nn.Linear default: U(-1/sqrt(in), 1/sqrt(in)).
    # All layout work (transpose to [in, out], optional bf16 cast) is done once here,
    # so the forward hot path is a single pallas_call.
    kw, kb = jax.random.split(key)
    bound = 1.0 / jnp.sqrt(jnp.float32(in_features))
    w = jax.random.uniform(kw, (in_features, out_features), jnp.float32,
                           minval=-bound, maxval=bound).astype(dtype)
    b = jax.random.uniform(kb, (1, out_features), jnp.float32,
                           minval=-bound, maxval=bound)
    return w, b


if __name__ == "__main__":
    state_size = 16
    action_size = 4

    key = jax.random.PRNGKey(0)
    k_x, k1, k2, k3 = jax.random.split(key, 4)

    w1, b1 = init_linear_params(k1, state_size, 128)
    w2, b2 = init_linear_params(k2, 128, 32)
    w3, b3 = init_linear_params(k3, 32, action_size)

    def ref_forward(x):
        h = jnp.maximum(x @ w1 + b1, 0.0)
        h = jnp.maximum(h @ w2 + b2, 0.0)
        return jnp.maximum(h @ w3 + b3, 0.0)

    # 1) Small actor-style batch (single grid step), f32, tight tolerance.
    x_small = jax.random.normal(k_x, (8, state_size), jnp.float32)
    q_small = jax.block_until_ready(mlp_forward(x_small, w1, b1, w2, b2, w3, b3))
    assert q_small.shape == (8, action_size)
    assert jnp.allclose(q_small, ref_forward(x_small), atol=1e-5, rtol=1e-5)

    # 2) Replay-buffer-style batch, non-multiple of the tile -> multiple grid steps
    #    with a ragged (masked) last block, no wrapper-side padding.
    x_big = jax.random.normal(k_x, (200, state_size), jnp.float32)
    q_big = jax.block_until_ready(
        mlp_forward(x_big, w1, b1, w2, b2, w3, b3, block_batch=64))
    assert q_big.shape == (200, action_size)
    assert jnp.allclose(q_big, ref_forward(x_big), atol=1e-5, rtol=1e-5)

    # 3) bf16 weights (native MXU bf16 path, half the matmul-input HBM traffic);
    #    x stays f32 in HBM and is cast inside the kernel; accumulate stays f32.
    w1b, w2b, w3b = (w.astype(jnp.bfloat16) for w in (w1, w2, w3))
    q_bf16 = jax.block_until_ready(
        mlp_forward(x_big, w1b, b1, w2b, b2, w3b, b3, block_batch=64))
    assert q_bf16.shape == (200, action_size)
    assert jnp.allclose(q_bf16, ref_forward(x_big), atol=5e-2, rtol=5e-2)

    print("KERNEL_OK")
</pallas_src>

<mosaic_0001>
module attributes {stable_mosaic.version = 11 : i64} {
  func.func @mlp_kernel(%arg0: i32, %arg1: memref<8x16xf32, #tpu.memory_space<vmem>>, %arg2: memref<16x128xf32, #tpu.memory_space<vmem>>, %arg3: memref<1x128xf32, #tpu.memory_space<vmem>>, %arg4: memref<128x32xf32, #tpu.memory_space<vmem>>, %arg5: memref<1x32xf32, #tpu.memory_space<vmem>>, %arg6: memref<32x4xf32, #tpu.memory_space<vmem>>, %arg7: memref<1x4xf32, #tpu.memory_space<vmem>>, %arg8: memref<8x4xf32, #tpu.memory_space<vmem>>) attributes {dimension_semantics = [#tpu.dimension_semantics<parallel>], iteration_bounds = array<i64: 1>, scalar_prefetch = 0 : i64, scratch_operands = 0 : i64, tpu.core_type = #tpu.core_type<tc>, window_params = [{transform_indices = @transform_0, window_bounds = array<i64: 8, 16>}, {pipeline_mode = #tpu.pipeline_mode<synchronous>, transform_indices = @transform_1, window_bounds = array<i64: 16, 128>}, {pipeline_mode = #tpu.pipeline_mode<synchronous>, transform_indices = @transform_2, window_bounds = array<i64: 1, 128>}, {pipeline_mode = #tpu.pipeline_mode<synchronous>, transform_indices = @transform_3, window_bounds = array<i64: 128, 32>}, {pipeline_mode = #tpu.pipeline_mode<synchronous>, transform_indices = @transform_4, window_bounds = array<i64: 1, 32>}, {pipeline_mode = #tpu.pipeline_mode<synchronous>, transform_indices = @transform_5, window_bounds = array<i64: 32, 4>}, {pipeline_mode = #tpu.pipeline_mode<synchronous>, transform_indices = @transform_6, window_bounds = array<i64: 1, 4>}, {transform_indices = @transform_7, window_bounds = array<i64: 8, 4>}]} {
    %c0 = arith.constant 0 : index
    %c0_0 = arith.constant 0 : index
    %0 = vector.load %arg2[%c0, %c0_0] : memref<16x128xf32, #tpu.memory_space<vmem>>, vector<16x128xf32>
    %c0_1 = arith.constant 0 : index
    %c0_2 = arith.constant 0 : index
    %1 = vector.load %arg1[%c0_1, %c0_2] : memref<8x16xf32, #tpu.memory_space<vmem>>, vector<8x16xf32>
    %cst = arith.constant dense<0.000000e+00> : vector<8x128xf32>
    %2 = tpu.matmul %1, %0, %cst {dimension_numbers = #tpu.dot_dimension_numbers<[1], [0], [0], [1], [0, 0, 1, 1], [], []>} : vector<8x16xf32>, vector<16x128xf32>, vector<8x128xf32> -> vector<8x128xf32>
    %c0_3 = arith.constant 0 : index
    %c0_4 = arith.constant 0 : index
    %3 = vector.load %arg3[%c0_3, %c0_4] : memref<1x128xf32, #tpu.memory_space<vmem>>, vector<1x128xf32>
    %4 = vector.broadcast %3 : vector<1x128xf32> to vector<8x128xf32>
    %5 = arith.addf %2, %4 : vector<8x128xf32>
    %cst_5 = arith.constant 0.000000e+00 : f32
    %6 = vector.broadcast %cst_5 : f32 to vector<8x128xf32>
    %7 = arith.maximumf %5, %6 : vector<8x128xf32>
    %c0_6 = arith.constant 0 : index
    %c0_7 = arith.constant 0 : index
    %8 = vector.load %arg4[%c0_6, %c0_7] : memref<128x32xf32, #tpu.memory_space<vmem>>, vector<128x32xf32>
    %cst_8 = arith.constant dense<0.000000e+00> : vector<8x32xf32>
    %9 = tpu.matmul %7, %8, %cst_8 {dimension_numbers = #tpu.dot_dimension_numbers<[1], [0], [0], [1], [0, 0, 1, 1], [], []>} : vector<8x128xf32>, vector<128x32xf32>, vector<8x32xf32> -> vector<8x32xf32>
    %c0_9 = arith.constant 0 : index
    %c0_10 = arith.constant 0 : index
    %10 = vector.load %arg5[%c0_9, %c0_10] : memref<1x32xf32, #tpu.memory_space<vmem>>, vector<1x32xf32>
    %11 = vector.broadcast %10 : vector<1x32xf32> to vector<8x32xf32>
    %12 = arith.addf %9, %11 : vector<8x32xf32>
    %cst_11 = arith.constant 0.000000e+00 : f32
    %13 = vector.broadcast %cst_11 : f32 to vector<8x32xf32>
    %14 = arith.maximumf %12, %13 : vector<8x32xf32>
    %c0_12 = arith.constant 0 : index
    %c0_13 = arith.constant 0 : index
    %15 = vector.load %arg6[%c0_12, %c0_13] : memref<32x4xf32, #tpu.memory_space<vmem>>, vector<32x4xf32>
    %cst_14 = arith.constant dense<0.000000e+00> : vector<8x4xf32>
    %16 = tpu.matmul %14, %15, %cst_14 {dimension_numbers = #tpu.dot_dimension_numbers<[1], [0], [0], [1], [0, 0, 1, 1], [], []>} : vector<8x32xf32>, vector<32x4xf32>, vector<8x4xf32> -> vector<8x4xf32>
    %c0_15 = arith.constant 0 : index
    %c0_16 = arith.constant 0 : index
    %17 = vector.load %arg7[%c0_15, %c0_16] : memref<1x4xf32, #tpu.memory_space<vmem>>, vector<1x4xf32>
    %18 = vector.broadcast %17 : vector<1x4xf32> to vector<8x4xf32>
    %19 = arith.addf %16, %18 : vector<8x4xf32>
    %cst_17 = arith.constant 0.000000e+00 : f32
    %20 = vector.broadcast %cst_17 : f32 to vector<8x4xf32>
    %21 = arith.maximumf %19, %20 : vector<8x4xf32>
    %c0_18 = arith.constant 0 : index
    %c0_19 = arith.constant 0 : index
    %22 = vector.load %arg8[%c0_18, %c0_19] : memref<8x4xf32, #tpu.memory_space<vmem>>, vector<8x4xf32>
    tpu.vector_store %arg8[%c0_18, %c0_19], %21 {strides = array<i32>} : memref<8x4xf32, #tpu.memory_space<vmem>>, vector<8x4xf32>,
    return
  }
  func.func @transform_0(%arg0: i32) -> (i32, i32) {
    %c0_i32 = arith.constant 0 : i32
    %c0_i32_0 = arith.constant 0 : i32
    return %arg0, %c0_i32 : i32, i32
  }
  func.func @transform_1(%arg0: i32) -> (i32, i32) {
    %c0_i32 = arith.constant 0 : i32
    %c0_i32_0 = arith.constant 0 : i32
    %c0_i32_1 = arith.constant 0 : i32
    return %c0_i32, %c0_i32_0 : i32, i32
  }
  func.func @transform_2(%arg0: i32) -> (i32, i32) {
    %c0_i32 = arith.constant 0 : i32
    %c0_i32_0 = arith.constant 0 : i32
    %c0_i32_1 = arith.constant 0 : i32
    return %c0_i32, %c0_i32_0 : i32, i32
  }
  func.func @transform_3(%arg0: i32) -> (i32, i32) {
    %c0_i32 = arith.constant 0 : i32
    %c0_i32_0 = arith.constant 0 : i32
    %c0_i32_1 = arith.constant 0 : i32
    return %c0_i32, %c0_i32_0 : i32, i32
  }
  func.func @transform_4(%arg0: i32) -> (i32, i32) {
    %c0_i32 = arith.constant 0 : i32
    %c0_i32_0 = arith.constant 0 : i32
    %c0_i32_1 = arith.constant 0 : i32
    return %c0_i32, %c0_i32_0 : i32, i32
  }
  func.func @transform_5(%arg0: i32) -> (i32, i32) {
    %c0_i32 = arith.constant 0 : i32
    %c0_i32_0 = arith.constant 0 : i32
    %c0_i32_1 = arith.constant 0 : i32
    return %c0_i32, %c0_i32_0 : i32, i32
  }
  func.func @transform_6(%arg0: i32) -> (i32, i32) {
    %c0_i32 = arith.constant 0 : i32
    %c0_i32_0 = arith.constant 0 : i32
    %c0_i32_1 = arith.constant 0 : i32
    return %c0_i32, %c0_i32_0 : i32, i32
  }
  func.func @transform_7(%arg0: i32) -> (i32, i32) {
    %c0_i32 = arith.constant 0 : i32
    %c0_i32_0 = arith.constant 0 : i32
    return %arg0, %c0_i32 : i32, i32
  }
}

</mosaic_0001>

<bundles_post_ra>
// kernel: tpu_custom_call.1
= control target key start
LH: loop header
LB: loop body
LE: loop exit
PB: predicated region body
PF: predicated region fallthrough
CT: control target
= control target key end

     0   :  { %v416_v0 = vmov 0.0|0.0   ;;  %vm417_vm0 = vmmov 0   ;;  %v418_v3 = vmov 0.0   ;;  %vm36_vm1 = vcmask 130048   ;;  %s543_s1 = inlined_call_operand.vmem [shape: f32[16,128], index: 1, kind: input, shape index: {}]   ;;  %s544_s3 = inlined_call_operand.vmem [shape: f32[128,32], index: 3, kind: input, shape index: {}]   ;;  %s545_s0 = inlined_call_operand.vmem [shape: f32[8,16], index: 0, kind: input, shape index: {}]   ;;  %s546_s5 = inlined_call_operand.vmem [shape: f32[32,4], index: 5, kind: input, shape index: {}]   ;;  %s547_s2 = inlined_call_operand.vmem [shape: f32[1,128], index: 2, kind: input, shape index: {}]   ;;  %s548_s4 = inlined_call_operand.vmem [shape: f32[1,32], index: 4, kind: input, shape index: {}]   ;;  %s549_s6 = inlined_call_operand.vmem [shape: f32[1,4], index: 6, kind: input, shape index: {}]   ;;  %s550_s7 = inlined_call_operand.vmem [shape: f32[8,4], index: 7, kind: output, shape index: {}]  }
   0x1   :  { %380 = vmatprep.subr.bf16.mxu0 %v416_v0  ;;  %v26_v1 = vld [vmem:[%s543_s1] sm:$0xff]  ;;  %v27_v2 = vld [vmem:[%s543_s1 + $0x8] sm:$0xff]  ;;  %331 = vmatprep.mubr.msk.f32.mxu0 %vm417_vm0, %v418_v3  ;;  %v113_v7 = vld [vmem:[%s544_s3 + $0x10] sm:$0xff]  ;;  %vm216_vm2 = vcmask 261120   ;;  %vm291_vm3 = vcmask 31744  }
   0x2   :  { %v381_v4 = vpack.c.bf16 %v27_v2, %v26_v1  ;;  %383 = vmatprep.subr.bf16.mxu1 %v416_v0  ;;  %v111_v5 = vld [vmem:[%s544_s3] sm:$0xff]  ;;  %v112_v6 = vld [vmem:[%s544_s3 + $0x8] sm:$0xff]  ;;  %366 = vmatprep.mubr.msk.f32.mxu1 %vm417_vm0, %v418_v3  ;;  %v114_v9 = vld [vmem:[%s544_s3 + $0x18] sm:$0xff] }
   0x3   :  { %v384_v8 = vpack.c.bf16 %v112_v6, %v111_v5  ;;  %v28_v10 = vld [vmem:[%s545_s0] sm:$0xff]  ;;  %v387_v11 = vpack.c.bf16 %v114_v9, %v113_v7  ;;  %v116_v13 = vld [vmem:[%s544_s3 + $0x28] sm:$0xff]  ;;  %v117_v15 = vld [vmem:[%s544_s3 + $0x30] sm:$0xff] }
   0x4   :  { %382 = vmatpush3.bf16.msra.mxu0 %v381_v4  ;;  %v115_v12 = vld [vmem:[%s544_s3 + $0x20] sm:$0xff]  ;;  %v118_v16 = vld [vmem:[%s544_s3 + $0x38] sm:$0xff]  ;;  %v120_v19 = vld [vmem:[%s544_s3 + $0x48] sm:$0xff] }
   0x5   :  { %385 = vmatpush3.bf16.msra.mxu1 %v384_v8  ;;  %407 = vmatprep.subr.bf16.mxu0 %v416_v0  ;;  %v390_v14 = vpack.c.bf16 %v116_v13, %v115_v12  ;;  %v393_v17 = vpack.c.bf16 %v118_v16, %v117_v15  ;;  %v119_v18 = vld [vmem:[%s544_s3 + $0x40] sm:$0xff]  ;;  %v121_v21 = vld [vmem:[%s544_s3 + $0x50] sm:$0xff]  ;;  %v122_v22 = vld [vmem:[%s544_s3 + $0x58] sm:$0xff] }
   0x6   :  { %386 = vmatprep.subr.bf16.mxu1 %v416_v0  ;;  %v396_v20 = vpack.c.bf16 %v120_v19, %v119_v18  ;;  %v399_v23 = vpack.c.bf16 %v122_v22, %v121_v21  ;;  %v123_v24 = vld [vmem:[%s544_s3 + $0x60] sm:$0xff]  ;;  %v124_v25 = vld [vmem:[%s544_s3 + $0x68] sm:$0xff]  ;;  %v125_v27 = vld [vmem:[%s544_s3 + $0x70] sm:$0xff] }
   0x7   :  { %332 = vmatmul.mubr.msk.f32.vlgmr.msra.gmra.mrb[0].mxu0 %vm36_vm1, %v28_v10  ;;  %v402_v26 = vpack.c.bf16 %v124_v25, %v123_v24  ;;  %v126_v28 = vld [vmem:[%s544_s3 + $0x78] sm:$0xff]  ;;  %v205_v30 = vld [vmem:[%s546_s5] sm:$0xff]  ;;  %v206_v31 = vld [vmem:[%s546_s5 + $0x8] sm:$0xff] }
   0x8   :  { %377 = vmatprep.mubr.msk.f32.mxu0 %vm417_vm0, %v418_v3  ;;  %v405_v29 = vpack.c.bf16 %v126_v28, %v125_v27  ;;  %v408_v32 = vpack.c.bf16 %v206_v31, %v205_v30  ;;  %v297_v33 = vld [vmem:[%s547_s2] ss:$0 sm:$0xff]  ;;  %v207_v38 = vld [vmem:[%s546_s5 + $0x10] sm:$0xff]  ;;  %v208_v39 = vld [vmem:[%s546_s5 + $0x18] sm:$0xff] }
   0x9   :  { %388 = vmatpush3.bf16.msra.mxu1 %v387_v11  ;;  %v411_v40 = vpack.c.bf16 %v208_v39, %v207_v38  ;;  %v299_v41 = vld [vmem:[%s548_s4] ss:$0 sm:$0xff] }
   0xa   :  { %389 = vmatprep.subr.bf16.mxu1 %v416_v0  ;;  %409 = vmatpush3.bf16.msra.mxu0 %v408_v32  ;;  %v300_v46 = vld [vmem:[%s549_s6] ss:$0 sm:$0xff] }
   0xb   :  { %410 = vmatprep.subr.bf16.mxu0 %v416_v0 }
   0xd   :  { %391 = vmatpush3.bf16.msra.mxu1 %v390_v14 }
   0xe   :  { %392 = vmatprep.subr.bf16.mxu1 %v416_v0  ;;  %412 = vmatpush3.bf16.msra.mxu0 %v411_v40 }
  0x11   :  { %394 = vmatpush3.bf16.msra.mxu1 %v393_v17 }
  0x12   :  { %395 = vmatprep.subr.bf16.mxu1 %v416_v0 }
  0x15   :  { %397 = vmatpush3.bf16.msra.mxu1 %v396_v20 }
  0x16   :  { %398 = vmatprep.subr.bf16.mxu1 %v416_v0 }
  0x19   :  { %400 = vmatpush3.bf16.msra.mxu1 %v399_v23 }
  0x1a   :  { %401 = vmatprep.subr.bf16.mxu1 %v416_v0 }
  0x1d   :  { %403 = vmatpush3.bf16.msra.mxu1 %v402_v26 }
  0x1e   :  { %404 = vmatprep.subr.bf16.mxu1 %v416_v0 }
  0x21   :  { %406 = vmatpush3.bf16.msra.mxu1 %v405_v29 }
  0xda   :  { %v106_v34 = vpop.f32.mrb[0].mxu0 }
  0xdb   :  { %v107_v35 = vadd.f32 %v297_v33, %v106_v34  ;;  %v333_v36 = vpop.f32.mrb[1].mxu0 }
  0xdd   :  { %v110_v37 = vmax.f32 %v107_v35, 0.0 }
  0xdf   :  { %367 = vmatmul.mubr.f32.vlgmr.msra.gmra.mrb[0].mxu1 %v110_v37 }
 0x1b2   :  { %v200_v42 = vpop.f32.mrb[0].mxu1 }
 0x1b3   :  { %v201_v43 = vadd.f32 %v299_v41, %v200_v42  ;;  %v368_v44 = vpop.f32.mrb[1].mxu1 }
 0x1b5   :  { %v204_v45 = vmax.f32 %v201_v43, 0.0 }
 0x1b7   :  { %378 = vmatmul.mubr.msk.f32.vlgmr.msra.gmra.mrb[2].mxu0 %vm216_vm2, %v204_v45 }
 0x28a   :  { %v286_v47 = vpop.f32.mrb[2].mxu0 }
 0x28b   :  { %v287_v48 = vadd.f32 %v300_v46, %v286_v47  ;;  %v379_v49 = vpop.f32.mrb[3].mxu0 }
 0x28d   :  { %v290_v50 = vmax.f32 %v287_v48, 0.0 }
 0x28f   :  { %292 = vst.msk [vmem:[%s550_s7] sm:$0xff] %vm291_vm3, %v290_v50 }

</bundles_post_ra>
